<compile_context>
chip_gen: v7x
topology: tpu7x:2x2x1
jax: 0.10.0
libtpu: 0.0.40
codegen_flags: <defaults>
</compile_context>

<pallas_src>
import functools

import numpy as np
import jax
import jax.numpy as jnp
from jax.experimental import pallas as pl
from jax.experimental.pallas import tpu as pltpu


def _round_up(x, m):
    return ((x + m - 1) // m) * m


# ----------------------------- RBF Gram kernel ------------------------------

def _rbf_kernel(z1_ref, z2row_ref, out_ref, *, inv_two_sigma):
    # out[a, j] = exp(-(z1[a] - z2[j])**2 * inv_two_sigma)
    z1 = z1_ref[...]                      # (tr, 1)  rows on sublanes
    z2 = z2row_ref[...]                   # (1, tc)  cols on lanes
    diff = z1 - z2                        # (tr, tc) via broadcast
    out_ref[...] = jnp.exp(-(diff * diff) * inv_two_sigma)


def rbf_gram(z1, z2, inv_two_sigma, *, tr=512, tc=512):
    """exp(-sqeuclidean(z1, z2) / (2*sigma)); z1:(r,1), z2:(c,1) -> (r, c) f32.

    z1 rows land on sublanes (padded to 8), z2 rows on lanes (padded to 128),
    so pass the *small* operand first to minimize padded exp work.
    """
    r = z1.shape[0]
    c = z2.shape[0]
    tr = min(tr, _round_up(r, 8))         # sublane-aligned tile
    tc = min(tc, _round_up(c, 128))       # lane-aligned tile
    r_pad = _round_up(r, tr)
    c_pad = _round_up(c, tc)

    z1p = jnp.zeros((r_pad, 1), jnp.float32).at[:r, :].set(z1.astype(jnp.float32))
    z2p = jnp.zeros((1, c_pad), jnp.float32).at[:, :c].set(z2.astype(jnp.float32).T)

    kernel = functools.partial(_rbf_kernel, inv_two_sigma=float(inv_two_sigma))
    out = pl.pallas_call(
        kernel,
        out_shape=jax.ShapeDtypeStruct((r_pad, c_pad), jnp.float32),
        grid_spec=pltpu.PrefetchScalarGridSpec(
            num_scalar_prefetch=0,
            grid=(r_pad // tr, c_pad // tc),
            in_specs=[pl.BlockSpec((tr, 1), lambda i, j: (i, 0)),
                      pl.BlockSpec((1, tc), lambda i, j: (0, j))],
            out_specs=pl.BlockSpec((tr, tc), lambda i, j: (i, j)),
        ),
        compiler_params=pltpu.CompilerParams(
            dimension_semantics=("parallel", "parallel")),
    )(z1p, z2p)
    return out[:r, :c]


# --------------------------- weighted trig kernel ----------------------------

def _weighted_trig_kernel(chi_ref, xT_ref, rhs_ref, gT_ref, out_ref, acc_ref, *, d):
    # grid = (batch tiles [parallel], n tiles [arbitrary / reduction])
    k = pl.program_id(1)

    @pl.when(k == 0)
    def _():
        acc_ref[...] = jnp.zeros_like(acc_ref)

    chi = chi_ref[...]                    # (tb, d)
    gT = gT_ref[...]                      # (tb, tn)  gamma_x.T slab (zeros on padded rows/lanes)
    tb = gT.shape[0]

    cacc = jnp.zeros((tb, 2), jnp.float32)    # [numer_cos, denom_cos]
    sacc = jnp.zeros((tb, 2), jnp.float32)    # [numer_sin, denom_sin]
    # TODO(synk): for d >= ~8 switch to lax.fori_loop(..., unroll=2) to bound live ranges.
    for i in range(d):                    # d is tiny & static -> unrolled
        xi = xT_ref[i:i + 1, :]                       # (1, tn)   row of x^T
        rhs = rhs_ref[:, i * 128:(i + 1) * 128]       # (tn, 128) cols: [x_i, 1, 0, ...]
        theta = chi[:, i:i + 1] * xi                  # (tb, tn)  chi[:, i] (x) x[:, i]
        cg = jnp.cos(theta) * gT                      # fused per-vreg, no big accumulators
        sg = jnp.sin(theta) * gT
        # Skinny matmuls on the otherwise-idle MXU do the gamma-weighted lane sums.
        cd = jnp.dot(cg, rhs, preferred_element_type=jnp.float32)   # (tb, 128)
        sd = jnp.dot(sg, rhs, preferred_element_type=jnp.float32)
        cacc = cacc + cd[:, 0:2]                      # [nc_i, dc_i]
        sacc = sacc + sd[:, 0:2]                      # [ns_i, ds_i]

    # tiny (tb, 4) partial-sum update per reduction step; columns [nc, dc, ns, ds]
    acc_ref[...] += jnp.concatenate([cacc, sacc], axis=-1)

    @pl.when(k == pl.num_programs(1) - 1)
    def _():
        out_ref[...] = acc_ref[...]


def weighted_trig(chi_idx, xT, gammaT, *, tb=128, tn=512):
    """Returns (numer_cos, numer_sin, denom_cos, denom_sin), each (b, 1) float32."""
    b, d = chi_idx.shape
    n = gammaT.shape[1]
    tb = min(tb, _round_up(b, 8))
    # Ensure the 'parallel' batch axis spans >= 2 grid steps when possible (v7x megacore).
    if b > 8 and _round_up(b, tb) // tb < 2:
        tb = _round_up((b + 1) // 2, 8)
    tn = min(tn, _round_up(n, 128))
    b_pad = _round_up(b, tb)
    n_pad = _round_up(n, tn)

    chi_p = jnp.zeros((b_pad, d), jnp.float32).at[:b, :].set(chi_idx.astype(jnp.float32))
    xT_p = jnp.zeros((d, n_pad), jnp.float32).at[:, :n].set(xT.astype(jnp.float32))
    # zero-padded gamma rows/lanes annihilate every padded contribution
    gT_p = jnp.zeros((b_pad, n_pad), jnp.float32).at[:b, :n].set(gammaT.astype(jnp.float32))
    # MXU RHS: per feature i a lane-aligned 128-wide block [x_i | ones | zeros...]
    rhs_p = jnp.zeros((n_pad, d * 128), jnp.float32)
    for i in range(d):
        rhs_p = rhs_p.at[:n, i * 128 + 0].set(xT[i, :].astype(jnp.float32))
        rhs_p = rhs_p.at[:, i * 128 + 1].set(1.0)

    kernel = functools.partial(_weighted_trig_kernel, d=d)
    out = pl.pallas_call(
        kernel,
        out_shape=jax.ShapeDtypeStruct((b_pad, 4), jnp.float32),
        grid_spec=pltpu.PrefetchScalarGridSpec(
            num_scalar_prefetch=0,
            grid=(b_pad // tb, n_pad // tn),
            in_specs=[pl.BlockSpec((tb, d), lambda i, k: (i, 0)),
                      pl.BlockSpec((d, tn), lambda i, k: (0, k)),
                      pl.BlockSpec((tn, d * 128), lambda i, k: (k, 0)),
                      pl.BlockSpec((tb, tn), lambda i, k: (i, k))],
            out_specs=pl.BlockSpec((tb, 4), lambda i, k: (i, 0)),
            scratch_shapes=[pltpu.VMEM((tb, 4), jnp.float32)],
        ),
        compiler_params=pltpu.CompilerParams(
            dimension_semantics=("parallel", "arbitrary")),
    )(chi_p, xT_p, rhs_p, gT_p)

    out = out[:b]
    # columns: [nc, dc, ns, ds]
    return out[:, 0:1], out[:, 2:3], out[:, 1:2], out[:, 3:4]


# ------------------------------ Model wrapper --------------------------------

class ModelPallas:
    def __init__(self, stageM_data, train_params, stage1_MNZ):
        self.stageM_data = stageM_data
        self.stage1_MNZ = stage1_MNZ
        d = stage1_MNZ['N'].shape[1]
        # x_initialiser = (M[:, :d_N] + N) / 2 ; lambda_x aliases x (lambda_x is None in train_params)
        self.x = (jnp.asarray(stage1_MNZ['M'], jnp.float32)[:, :d]
                  + jnp.asarray(stage1_MNZ['N'], jnp.float32)) / 2.0          # (n, d)
        self.lambda_x = self.x
        self.xT = self.x.T                                                    # (d, n), precomputed
        self.sigmaZ = float(stage1_MNZ['sigmaZ'])
        self.inv_two_sigma = 1.0 / (2.0 * self.sigmaZ)
        self.Z1 = jnp.asarray(stage1_MNZ['Z'], jnp.float32)                   # (n, 1)
        n = self.Z1.shape[0]
        self.n = n

        self.KZ1Z1 = rbf_gram(self.Z1, self.Z1, self.inv_two_sigma)           # (n, n), Pallas
        # A is constant across forward calls -> factorize once.
        lam = jnp.sum(jnp.exp(self.lambda_x), axis=1)                         # (n,)
        A = self.KZ1Z1 + n * jnp.diag(lam)
        # TODO(synk): dense LU factorization / triangular solve has no clean Pallas equivalent; done in XLA.
        self.A_lu = jax.scipy.linalg.lu_factor(A)

        self.Z_M = jnp.asarray(stageM_data['Z'], jnp.float32)                 # (m, 1)
        self.Chi_M = jnp.asarray(stageM_data['Chi'], jnp.float32)             # (m, d)
        self._forward_jit = jax.jit(self._forward_impl)

    def _forward_impl(self, idx):
        z = self.Z_M[idx]                                                     # (b, 1)
        # Small batch on sublanes, n on lanes -> minimal padded exp work.
        K_zZ1 = rbf_gram(z, self.Z1, self.inv_two_sigma)                      # (b, n), Pallas
        # RBF kernel is symmetric, so K_Z1z = K_zZ1.T exactly.
        gamma_x = jax.scipy.linalg.lu_solve(self.A_lu, K_zZ1.T)               # (n, b), cached LU
        chi_idx = self.Chi_M[idx]                                             # (b, d)
        nc, ns, dc, ds = weighted_trig(chi_idx, self.xT, gamma_x.T)           # Pallas hot path
        numer = nc + 1j * ns
        denom = dc + 1j * ds
        return numer / denom                                                  # (b, 1) complex64

    def forward(self, idx):
        return self._forward_jit(idx)


# ----------------------------------- main -------------------------------------

if __name__ == "__main__":
    key = jax.random.PRNGKey(0)
    n, d, m_total, b = 16, 2, 32, 8
    k1, k2, k3, k4, k5 = jax.random.split(key, 5)
    Z1 = jax.random.normal(k1, (n, 1), jnp.float32)
    M1 = 0.5 * jax.random.normal(k2, (n, d), jnp.float32)
    N1 = 0.5 * jax.random.normal(k3, (n, d), jnp.float32)
    Z_M = jax.random.normal(k4, (m_total, 1), jnp.float32)
    Chi_M = jax.random.normal(k5, (m_total, d), jnp.float32)

    # sigmaZ = median pairwise sqeuclidean distance over Z1 (setup-time glue, as in the reference).
    Z1n = np.asarray(Z1, np.float64)
    sigmaZ = float(np.median((Z1n - Z1n.T) ** 2))

    stage1_MNZ = {'M': np.asarray(M1), 'N': np.asarray(N1), 'Z': np.asarray(Z1), 'sigmaZ': sigmaZ}
    train_params = {'lambda_x': None, 'reg_param': 0.0}
    stageM_data = {'labels': None, 'Chi': np.asarray(Chi_M), 'Z': np.asarray(Z_M)}

    model = ModelPallas(stageM_data, train_params, stage1_MNZ)
    idx = jnp.arange(b, dtype=jnp.int32)
    out = jax.block_until_ready(model.forward(idx))

    # numpy reference check (same math, float64)
    xn = np.asarray(model.x, np.float64)
    zM = np.asarray(Z_M, np.float64)
    chiM = np.asarray(Chi_M, np.float64)
    idx_np = np.asarray(idx)
    KZ1Z1 = np.exp(-((Z1n - Z1n.T) ** 2) / (2.0 * sigmaZ))
    z_sel = zM[idx_np]
    KZ1z = np.exp(-((Z1n - z_sel.T) ** 2) / (2.0 * sigmaZ))
    A = KZ1Z1 + n * np.diag(np.exp(xn).sum(axis=1))
    g = np.linalg.solve(A, KZ1z)
    chin = chiM[idx_np]
    nc = ns = dc = ds = 0.0
    for i in range(d):
        th = chin[:, i:i + 1] * xn[:, i][None, :]
        c, s = np.cos(th), np.sin(th)
        gT = g.T
        dc = dc + (c * gT).sum(-1, keepdims=True)
        ds = ds + (s * gT).sum(-1, keepdims=True)
        nc = nc + (c * gT * xn[:, i][None, :]).sum(-1, keepdims=True)
        ns = ns + (s * gT * xn[:, i][None, :]).sum(-1, keepdims=True)
    ref = (nc + 1j * ns) / (dc + 1j * ds)
    assert out.shape == (b, 1)
    assert np.allclose(np.asarray(out), ref, rtol=1e-2, atol=1e-3), "mismatch vs numpy reference"

    print("KERNEL_OK")
</pallas_src>

<mosaic_0001>
module attributes {stable_mosaic.version = 11 : i64} {
  func.func @_rbf_kernel(%arg0: i32, %arg1: i32, %arg2: memref<16x1xf32, #tpu.memory_space<vmem>>, %arg3: memref<1x128xf32, #tpu.memory_space<vmem>>, %arg4: memref<16x128xf32, #tpu.memory_space<vmem>>) attributes {dimension_semantics = [#tpu.dimension_semantics<parallel>, #tpu.dimension_semantics<parallel>], iteration_bounds = array<i64: 1, 1>, scalar_prefetch = 0 : i64, scratch_operands = 0 : i64, tpu.core_type = #tpu.core_type<tc>, window_params = [{transform_indices = @transform_0, window_bounds = array<i64: 16, 1>}, {transform_indices = @transform_1, window_bounds = array<i64: 1, 128>}, {transform_indices = @transform_2, window_bounds = array<i64: 16, 128>}]} {
    %c0 = arith.constant 0 : index
    %c0_0 = arith.constant 0 : index
    %0 = vector.load %arg2[%c0, %c0_0] : memref<16x1xf32, #tpu.memory_space<vmem>>, vector<16x1xf32>
    %c0_1 = arith.constant 0 : index
    %c0_2 = arith.constant 0 : index
    %1 = vector.load %arg3[%c0_1, %c0_2] : memref<1x128xf32, #tpu.memory_space<vmem>>, vector<1x128xf32>
    %2 = vector.broadcast %0 : vector<16x1xf32> to vector<16x128xf32>
    %3 = vector.broadcast %1 : vector<1x128xf32> to vector<16x128xf32>
    %4 = arith.subf %2, %3 : vector<16x128xf32>
    %5 = arith.mulf %4, %4 : vector<16x128xf32>
    %cst = arith.constant 0.000000e+00 : f32
    %6 = vector.broadcast %cst : f32 to vector<16x128xf32>
    %7 = arith.subf %6, %5 : vector<16x128xf32>
    %cst_3 = arith.constant 0.37397024 : f32
    %8 = vector.broadcast %cst_3 : f32 to vector<16x128xf32>
    %9 = arith.mulf %7, %8 : vector<16x128xf32>
    %10 = math.exp %9 : vector<16x128xf32>
    %c0_4 = arith.constant 0 : index
    %c0_5 = arith.constant 0 : index
    %11 = vector.load %arg4[%c0_4, %c0_5] : memref<16x128xf32, #tpu.memory_space<vmem>>, vector<16x128xf32>
    tpu.vector_store %arg4[%c0_4, %c0_5], %10 {strides = array<i32>} : memref<16x128xf32, #tpu.memory_space<vmem>>, vector<16x128xf32>,
    return
  }
  func.func @transform_0(%arg0: i32, %arg1: i32) -> (i32, i32) {
    %c0_i32 = arith.constant 0 : i32
    %c0_i32_0 = arith.constant 0 : i32
    return %arg0, %c0_i32 : i32, i32
  }
  func.func @transform_1(%arg0: i32, %arg1: i32) -> (i32, i32) {
    %c0_i32 = arith.constant 0 : i32
    %c0_i32_0 = arith.constant 0 : i32
    return %c0_i32, %arg1 : i32, i32
  }
  func.func @transform_2(%arg0: i32, %arg1: i32) -> (i32, i32) {
    %c0_i32 = arith.constant 0 : i32
    return %arg0, %arg1 : i32, i32
  }
}

</mosaic_0001>

<bundles_post_ra>
// kernel: tpu_custom_call.1
= control target key start
LH: loop header
LB: loop body
LE: loop exit
PB: predicated region body
PF: predicated region fallthrough
CT: control target
= control target key end

     0   :  { %v95_v1 = vmov 0   ;;  %s135_s0 = inlined_call_operand.vmem [shape: f32[16,1], index: 0, kind: input, shape index: {}]   ;;  %s136_s1 = inlined_call_operand.vmem [shape: f32[1,128], index: 1, kind: input, shape index: {}]   ;;  %s137_s2 = inlined_call_operand.hbm [shape: f32[16,128], index: 2, kind: output, shape index: {}]  }
   0x1   :  { %v12_v0 = vld [vmem:[%s135_s0] sm:$0xff]  ;;  %66 = vset.pattern.permute.xlu0 %v95_v1 }
   0x2   :  { %7 = vsyncpa [#allocation3], 0  ;;  %17 = vperm.xlu0 %66, %v12_v0   ;;  %v13_v2 = vld [vmem:[%s135_s0 + $0x8] sm:$0xff]  ;;  %v61_v3 = vld [vmem:[%s136_s1] ss:$0 sm:$0xff]  ;;  %s96_s0 = smov [#allocation2]  }
   0x3   :  { %s50_s15 = sshll.u32 %s96_s0, 4  ;;  %s51_s15 = int_to_ptr.vmem [resolvable:$true] %s50_s15 }
   0x4   :  { %s71_s1 = scalar_lea.vmem %s51_s15, 256  ;;  %p76_p1 = scmp.lt.s32.totalorder %s51_s15, %s51_s15 }
   0x5   :  { %p72_p0 = scmp.ne.s32.totalorder %s51_s15, %s71_s1  ;;  %p77_p2 = scmp.lt.s32.totalorder %s71_s1, %s71_s1 }
   0x6   :  { %22 = vperm.xlu0 %66, %v13_v2  }
   0x7   :  { %p78_p3 = por %p77_p2, %p76_p1 }
   0x9   :  { %p79_p4 = pnand %p78_p3, %p72_p0 }
  0x81   :  { %v18_v4 = vpop.permute.xlu0 %17 }
  0x82   :  { %v31_v5 = vsub.f32 %v18_v4, %v61_v3 }
  0x84   :  { %v33_v6 = vmul.f32 %v31_v5, %v31_v5 }
  0x85   :  { %v23_v7 = vpop.permute.xlu0 %22 }
  0x86   :  { %v35_v8 = vsub.f32 0.0, %v33_v6  ;;  %v32_v9 = vsub.f32 %v23_v7, %v61_v3 }
  0x88   :  { %v37_v10 = vmul.f32 0.37397024, %v35_v8  ;;  %v34_v11 = vmul.f32 %v32_v9, %v32_v9 }
  0x8a   :  { %v39_v12 = vmul.f32 1.442695, %v37_v10  ;;  %v36_v13 = vsub.f32 0.0, %v34_v11 }
  0x8c   :  { %67 = vpow2.f32 %v39_v12  ;;  %v38_v14 = vmul.f32 0.37397024, %v36_v13 }
  0x8e   :  { %v41_v15 = vmul.f32 1.442695, %v38_v14 }
  0x90   :  { %69 = vpow2.f32 %v41_v15 }
  0x96   :  { %v68_v16 = vpop.eup %67 }
  0x97   :  { %43 = vst [vmem:[#allocation2] sm:$0xff] %v68_v16 }
  0x9a   :  { %v70_v17 = vpop.eup %69 }
  0x9b   :  { %44 = vst [vmem:[#allocation2 + $0x8] sm:$0xff] %v70_v17 }
  0x9c   :  { %82 = shalt.err (!%p79_p4)
}
  0x9d   :  { %s83_s18 = scalar_lea.hbm %s137_s2, 256 }
  0x9e   :  { %p84_p5 = scmp.ne.s32.totalorder %s137_s2, %s83_s18  ;;  %p87_p6 = scmp.lt.u32.totalorder %s83_s18, %s137_s2 }
  0xa0   :  { %p89_p7 = pnand %p87_p6, %p84_p5 }
  0xa2   :  { %92 = shalt.err (!%p89_p7)
}
  0xa3   :  { %s97_s23 = smov 128   ;;  %s98_s24 = smov 8  }
  0xa4   :  { %56 = dma.vmem_to_hbm [thread:$0]  %s51_s15, 256, %s137_s2, [#allocation3], %s97_s23, %s97_s23, %s98_s24  }
  0xa5   :  { %93 = dma.done.wait [#allocation3], 256  }
  0xa6   :  { %94 = vsyncadd [#allocation3], 4294967040 }
  0xa7   :  { %60 = vsyncpa [#allocation3], 1 }

</bundles_post_ra>
